<compile_context>
chip_gen: v7x
topology: tpu7x:2x2x1
jax: 0.10.0
libtpu: 0.0.40
codegen_flags: <defaults>
</compile_context>

<pallas_src>
import functools

import jax
import jax.numpy as jnp
from jax.experimental import pallas as pl
from jax.experimental.pallas import tpu as pltpu


def _locked_dropout_kernel(bits_ref, x_ref, o_ref, *, threshold: int, scale: float):
    # bits_ref : (bb, 1, H)  uint32 -- same block for every T tile of these rows
    # x_ref    : (bb, tt, H)
    # o_ref    : (bb, tt, H)
    dt = x_ref.dtype
    keep = bits_ref[...] < jnp.uint32(threshold)                 # exact P(keep) = 1-p
    mask = jnp.where(keep, jnp.asarray(scale, dt), jnp.asarray(0.0, dt))  # (bb, 1, H)
    o_ref[...] = x_ref[...] * mask                               # locked across time


def locked_dropout(x, *, dropout: float = 0.5, seed: int = 0, training: bool = True,
                   block_bytes: int = 4 << 20, donate_x: bool = False):
    """JAX/Pallas equivalent of LockedDropout.forward (batch_first=True)."""
    if (not training) or (not dropout):
        return x
    if not (0.0 < dropout < 1.0):
        # PyTorch's mask.div_(1-p) yields NaN at dropout == 1; be explicit instead.
        raise ValueError("dropout must be in [0, 1) for LockedDropout")

    orig_ndim = x.ndim
    if orig_ndim == 2:
        x3 = x[:, None, :]          # per-element mask == locked mask with T == 1
    elif orig_ndim == 3:
        x3 = x
    else:
        raise ValueError("LockedDropout expects a 2-D or 3-D batch-first input")

    B, T, H = x3.shape
    keep_prob = 1.0 - float(dropout)
    # Exact uint32 threshold; the clamp biases P(keep) by ~2^-32 (negligible).
    threshold = min(int(round(keep_prob * 2.0 ** 32)), 2 ** 32 - 1)
    scale = 1.0 / keep_prob

    itemsize = jnp.dtype(x3.dtype).itemsize
    # Packed sublane quantum: 8 for f32, 16 for bf16/f16, 32 for int8/fp8.
    quantum = max(8, 32 // itemsize)

    # Time tile: a multiple of the quantum, or the whole (possibly unaligned) T
    # ("equal to the full array dim" is always a legal block shape).
    row_bytes = max(1, H * itemsize)
    rows_target = max(1, block_bytes // row_bytes)
    tt = max(quantum, (rows_target // quantum) * quantum)
    if tt >= T:
        tt = T
    # Batch tile: soak up the remaining budget when T is short (incl. 2-D path).
    bytes_per_b = max(1, tt * H * itemsize)
    bb = min(B, max(1, block_bytes // bytes_per_b))

    grid = (pl.cdiv(B, bb), pl.cdiv(T, tt))

    # One uint32 per (batch, hidden): the mask depends only on (b, h), never on
    # the T-tile index, which keeps it locked across time.
    bits = jax.random.bits(jax.random.PRNGKey(seed), (B, 1, H), dtype=jnp.uint32)

    kernel = functools.partial(_locked_dropout_kernel, threshold=threshold, scale=scale)

    out = pl.pallas_call(
        kernel,
        out_shape=jax.ShapeDtypeStruct((B, T, H), x3.dtype),
        grid_spec=pltpu.PrefetchScalarGridSpec(
            num_scalar_prefetch=0,
            grid=grid,
            in_specs=[
                pl.BlockSpec((bb, 1, H), lambda b, t: (b, 0, 0)),    # bits (locked)
                pl.BlockSpec((bb, tt, H), lambda b, t: (b, t, 0)),   # x tile
            ],
            out_specs=pl.BlockSpec((bb, tt, H), lambda b, t: (b, t, 0)),
        ),
        compiler_params=pltpu.CompilerParams(
            dimension_semantics=("parallel", "parallel"),  # megacore-shardable on v7x
            vmem_limit_bytes=32 << 20,                     # 4x ~4 MiB buffers fit everywhere
        ),
        input_output_aliases=({1: 0} if donate_x else {}),
    )(bits, x3)

    if orig_ndim == 2:
        out = jnp.squeeze(out, axis=1)
    return out


if __name__ == "__main__":
    key = jax.random.PRNGKey(0)
    B, T, H = 2, 8, 32
    x = jax.random.normal(key, (B, T, H), dtype=jnp.float32)

    dropout = 0.5
    y = jax.block_until_ready(locked_dropout(x, dropout=dropout, seed=1234, training=True))

    # --- sanity checks on LockedDropout semantics ---
    keep_scale = 1.0 / (1.0 - dropout)
    ratio = jnp.where(jnp.abs(x) > 0, y / x, 0.0)          # either 0 or 1/(1-p)
    assert bool(jnp.all(jnp.isclose(ratio, 0.0) | jnp.isclose(ratio, keep_scale))), \
        "mask values must be 0 or 1/(1-p)"
    assert bool(jnp.all(jnp.isclose(ratio, ratio[:, :1, :]))), \
        "mask must be shared across time steps"

    # Ragged grid path: T not a multiple of the tile, H not a multiple of 128,
    # bf16 (sublane quantum 16), tiny block target to force a multi-block grid.
    B2, T2, H2 = 3, 37, 160
    xb = jax.random.normal(jax.random.PRNGKey(2), (B2, T2, H2), dtype=jnp.bfloat16)
    yb = jax.block_until_ready(
        locked_dropout(xb, dropout=0.25, seed=99, block_bytes=8 * 1024))
    x32 = xb.astype(jnp.float32)
    rb = jnp.where(jnp.abs(x32) > 0, yb.astype(jnp.float32) / x32, 0.0)
    ks2 = 1.0 / (1.0 - 0.25)
    assert bool(jnp.all(jnp.isclose(rb, 0.0, atol=2e-2) | jnp.isclose(rb, ks2, atol=2e-2)))
    assert bool(jnp.all(jnp.isclose(rb, rb[:, :1, :], atol=3e-2)))

    # 2-D path (per-element mask).
    x2 = jax.random.normal(jax.random.PRNGKey(1), (B, H), dtype=jnp.float32)
    y2 = jax.block_until_ready(locked_dropout(x2, dropout=dropout, seed=7))
    r2 = jnp.where(jnp.abs(x2) > 0, y2 / x2, 0.0)
    assert bool(jnp.all(jnp.isclose(r2, 0.0) | jnp.isclose(r2, keep_scale)))
    assert y2.shape == x2.shape

    # eval / dropout=0 path is identity
    y_eval = locked_dropout(x, dropout=dropout, training=False)
    assert bool(jnp.all(y_eval == x))
    y_p0 = locked_dropout(x, dropout=0.0, training=True)
    assert bool(jnp.all(y_p0 == x))

    print("KERNEL_OK")
</pallas_src>

<mosaic_0001>
module attributes {stable_mosaic.version = 11 : i64} {
  func.func @_locked_dropout_kernel(%arg0: i32, %arg1: i32, %arg2: memref<2x1x32xi32, #tpu.memory_space<vmem>>, %arg3: memref<2x8x32xf32, #tpu.memory_space<vmem>>, %arg4: memref<2x8x32xf32, #tpu.memory_space<vmem>>) attributes {dimension_semantics = [#tpu.dimension_semantics<parallel>, #tpu.dimension_semantics<parallel>], iteration_bounds = array<i64: 1, 1>, scalar_prefetch = 0 : i64, scratch_operands = 0 : i64, tpu.core_type = #tpu.core_type<tc>, window_params = [{transform_indices = @transform_0, window_bounds = array<i64: 2, 1, 32>}, {transform_indices = @transform_1, window_bounds = array<i64: 2, 8, 32>}, {transform_indices = @transform_2, window_bounds = array<i64: 2, 8, 32>}]} {
    %c0 = arith.constant 0 : index
    %c0_0 = arith.constant 0 : index
    %c0_1 = arith.constant 0 : index
    %0 = vector.load %arg2[%c0, %c0_0, %c0_1] : memref<2x1x32xi32, #tpu.memory_space<vmem>>, vector<2x1x32xi32>
    %c-2147483648_i32 = arith.constant -2147483648 : i32
    %1 = vector.broadcast %c-2147483648_i32 : i32 to vector<2x1x32xi32>
    %2 = arith.cmpi ult, %0, %1 : vector<2x1x32xi32>
    %cst = arith.constant 2.000000e+00 : f32
    %cst_2 = arith.constant 0.000000e+00 : f32
    %3 = vector.broadcast %cst : f32 to vector<2x1x32xf32>
    %4 = vector.broadcast %cst_2 : f32 to vector<2x1x32xf32>
    %5 = arith.select %2, %3, %4 : vector<2x1x32xi1>, vector<2x1x32xf32>
    %c0_3 = arith.constant 0 : index
    %c0_4 = arith.constant 0 : index
    %c0_5 = arith.constant 0 : index
    %6 = vector.load %arg3[%c0_3, %c0_4, %c0_5] : memref<2x8x32xf32, #tpu.memory_space<vmem>>, vector<2x8x32xf32>
    %7 = vector.broadcast %5 : vector<2x1x32xf32> to vector<2x8x32xf32>
    %8 = arith.mulf %6, %7 : vector<2x8x32xf32>
    %c0_6 = arith.constant 0 : index
    %c0_7 = arith.constant 0 : index
    %c0_8 = arith.constant 0 : index
    %9 = vector.load %arg4[%c0_6, %c0_7, %c0_8] : memref<2x8x32xf32, #tpu.memory_space<vmem>>, vector<2x8x32xf32>
    tpu.vector_store %arg4[%c0_6, %c0_7, %c0_8], %8 {strides = array<i32>} : memref<2x8x32xf32, #tpu.memory_space<vmem>>, vector<2x8x32xf32>,
    return
  }
  func.func @transform_0(%arg0: i32, %arg1: i32) -> (i32, i32, i32) {
    %c0_i32 = arith.constant 0 : i32
    %c0_i32_0 = arith.constant 0 : i32
    %c0_i32_1 = arith.constant 0 : i32
    return %arg0, %c0_i32, %c0_i32_0 : i32, i32, i32
  }
  func.func @transform_1(%arg0: i32, %arg1: i32) -> (i32, i32, i32) {
    %c0_i32 = arith.constant 0 : i32
    %c0_i32_0 = arith.constant 0 : i32
    return %arg0, %arg1, %c0_i32 : i32, i32, i32
  }
  func.func @transform_2(%arg0: i32, %arg1: i32) -> (i32, i32, i32) {
    %c0_i32 = arith.constant 0 : i32
    %c0_i32_0 = arith.constant 0 : i32
    return %arg0, %arg1, %c0_i32 : i32, i32, i32
  }
}

</mosaic_0001>

<bundles_post_ra>
// kernel: tpu_custom_call.1
= control target key start
LH: loop header
LB: loop body
LE: loop exit
PB: predicated region body
PF: predicated region fallthrough
CT: control target
= control target key end

     0   :  { %7 = vsyncpa [#allocation3], 0  ;;  %s228_s0 = inlined_call_operand.hbm [shape: u32[2,1,32], index: 0, kind: input, shape index: {}]   ;;  %s229_s1 = inlined_call_operand.hbm [shape: f32[2,8,32], index: 1, kind: input, shape index: {}]   ;;  %s230_s2 = inlined_call_operand.hbm [shape: f32[2,8,32], index: 2, kind: output, shape index: {}]  }
   0x1   :  { %8 = vsyncpa [#allocation6], 0 }
   0x2   :  { %9 = vsyncpa [#allocation4], 0  ;;  %s163_s9 = smov [#allocation2]   ;;  %s91_s13 = scalar_lea.hbm %s228_s0, 32 }
   0x3   :  { %s15_s10 = sshll.u32 %s163_s9, 4  ;;  %p92_p0 = scmp.ne.s32.totalorder %s228_s0, %s91_s13  ;;  %s16_s10 = int_to_ptr.vmem [resolvable:$true] %s15_s10 }
   0x4   :  { %p95_p1 = scmp.lt.u32.totalorder %s91_s13, %s228_s0 }
   0x6   :  { %p97_p2 = pnand %p95_p1, %p92_p0 }
   0x8   :  { %100 = shalt.err (!%p97_p2)
}
   0x9   :  { %s101_s18 = scalar_lea.vmem %s16_s10, 32  ;;  %p106_p4 = scmp.lt.s32.totalorder %s16_s10, %s16_s10 }
   0xa   :  { %p102_p3 = scmp.ne.s32.totalorder %s16_s10, %s101_s18  ;;  %p107_p5 = scmp.lt.s32.totalorder %s101_s18, %s101_s18 }
   0xc   :  { %p108_p6 = por %p107_p5, %p106_p4 }
   0xe   :  { %p109_p7 = pnand %p108_p6, %p102_p3 }
  0x10   :  { %112 = shalt.err (!%p109_p7)
}
  0x11   :  { %s164_s19 = smov 16   ;;  %s165_s20 = smov 1  }
  0x12   :  { %21 = dma.hbm_to_vmem [thread:$0]  %s228_s0, 32, %s16_s10, [#allocation3], %s164_s19, %s164_s19, %s165_s20  }
  0x13   :  { %s166_s23 = smov [#allocation5]   ;;  %s113_s27 = scalar_lea.hbm %s229_s1, 256 }
  0x14   :  { %s27_s24 = sshll.u32 %s166_s23, 4  ;;  %p114_p8 = scmp.ne.s32.totalorder %s229_s1, %s113_s27  ;;  %s28_s24 = int_to_ptr.vmem [resolvable:$true] %s27_s24 }
  0x15   :  { %p117_p9 = scmp.lt.u32.totalorder %s113_s27, %s229_s1 }
  0x17   :  { %p119_p10 = pnand %p117_p9, %p114_p8 }
  0x19   :  { %122 = shalt.err (!%p119_p10)
}
  0x1a   :  { %s123_s4 = scalar_lea.vmem %s28_s24, 256  ;;  %p128_p12 = scmp.lt.s32.totalorder %s28_s24, %s28_s24 }
  0x1b   :  { %p124_p11 = scmp.ne.s32.totalorder %s28_s24, %s123_s4  ;;  %p129_p13 = scmp.lt.s32.totalorder %s123_s4, %s123_s4 }
  0x1d   :  { %p130_p0 = por %p129_p13, %p128_p12 }
  0x1f   :  { %p131_p1 = pnand %p130_p0, %p124_p11 }
  0x21   :  { %134 = shalt.err (!%p131_p1)
}
  0x22   :  { %s167_s0 = smov 128   ;;  %s168_s5 = smov 8  }
  0x23   :  { %33 = dma.hbm_to_vmem [thread:$0]  %s229_s1, 256, %s28_s24, [#allocation6], %s167_s0, %s167_s0, %s168_s5  }
  0x24   :  { %157 = dma.done.wait [#allocation3], 32  }
  0x25   :  { %158 = vsyncadd [#allocation3], 4294967264 }
  0x26   :  { %159 = dma.done.wait [#allocation6], 256  }
  0x27   :  { %160 = vsyncadd [#allocation6], 4294967040  ;;  %v50_v0 = vlaneseq  ;;  %v40_v3 = vld [vmem:[#allocation2] sm:$0x1]  ;;  %v41_v4 = vld [vmem:[#allocation2 + $0x1] sm:$0x1] }
  0x28   :  { %vm42_vm0 = vcmp.lt.u32.totalorder %v40_v3, 2147483648  ;;  %vm43_vm1 = vcmp.lt.u32.totalorder %v41_v4, 2147483648  ;;  %v169_v5 = vmov 0.0   ;;  %v46_v7 = vld [vmem:[#allocation5] sm:$0xff]  ;;  %v47_v9 = vld [vmem:[#allocation5 + $0x8] sm:$0xff]  ;;  %s170_s8 = smov [#allocation7]  }
  0x29   :  { %v51_v1 = vshrl.u32 %v50_v0, 7  ;;  %v44_v6 = vsel %vm42_vm0, 2.0, %v169_v5  ;;  %v45_v8 = vsel %vm43_vm1, 2.0, %v169_v5  ;;  %s70_s9 = sshll.u32 %s170_s8, 4  ;;  %vm62_vm2 = vcmask 261120   ;;  %s71_s9 = int_to_ptr.vmem [resolvable:$true] %s70_s9 }
  0x2a   :  { %s135_s1 = scalar_lea.vmem %s71_s9, 256  ;;  %p140_p3 = scmp.lt.s32.totalorder %s71_s9, %s71_s9 }
  0x2b   :  { %v52_v2 = vsub.s32 0, %v51_v1  ;;  %p136_p2 = scmp.ne.s32.totalorder %s71_s9, %s135_s1  ;;  %p141_p4 = scmp.lt.s32.totalorder %s135_s1, %s135_s1 }
  0x2d   :  { %v53_v10 = vrot.slane %v44_v6, %v52_v2  ;;  %v57_v11 = vrot.slane %v45_v8, %v52_v2  ;;  %p142_p5 = por %p141_p4, %p140_p3 }
  0x2f   :  { %v60_v12 = vmul.f32 %v53_v10, %v46_v7  ;;  %v61_v13 = vmul.f32 %v57_v11, %v47_v9  ;;  %p143_p6 = pnand %p142_p5, %p136_p2 }
  0x31   :  { %63 = vst.msk [vmem:[#allocation7] sm:$0xff] %vm62_vm2, %v60_v12  ;;  %64 = vst.msk [vmem:[#allocation7 + $0x8] sm:$0xff] %vm62_vm2, %v61_v13 }
  0x32   :  { %146 = shalt.err (!%p143_p6)
}
  0x33   :  { %s147_s12 = scalar_lea.hbm %s230_s2, 256 }
  0x34   :  { %p148_p7 = scmp.ne.s32.totalorder %s230_s2, %s147_s12  ;;  %p151_p8 = scmp.lt.u32.totalorder %s147_s12, %s230_s2 }
  0x36   :  { %p153_p9 = pnand %p151_p8, %p148_p7 }
  0x38   :  { %156 = shalt.err (!%p153_p9)
}
  0x39   :  { %76 = dma.vmem_to_hbm [thread:$0]  %s71_s9, 256, %s230_s2, [#allocation4], %s167_s0, %s167_s0, %s168_s5  }
  0x3a   :  { %161 = dma.done.wait [#allocation4], 256  }
  0x3b   :  { %162 = vsyncadd [#allocation4], 4294967040 }
  0x3c   :  { %80 = vsyncpa [#allocation3], 1 }
  0x3d   :  { %81 = vsyncpa [#allocation6], 1 }
  0x3e   :  { %82 = vsyncpa [#allocation4], 1 }

</bundles_post_ra>
